<compile_context>
chip_gen: v7x
topology: tpu7x:2x2x1
jax: 0.10.0
libtpu: 0.0.40
codegen_flags: <defaults>
</compile_context>

<pallas_src>
import math
import functools

import jax
import jax.numpy as jnp
from jax import lax
from jax.experimental import pallas as pl
from jax.experimental.pallas import tpu as pltpu


# ---------------------------------------------------------------------------
# Phase 1: fused QKV projection (each projection runs exactly once).
# ---------------------------------------------------------------------------
def _qkv_proj_kernel(q_ref, k_ref, v_ref, wq_ref, wk_ref, wv_ref,
                     bq_ref, bk_ref, bv_ref, qp_ref, kp_ref, vp_ref, *, scale):
    """One (batch, row-tile) step: three (ts, D) @ (D, D) MXU matmuls."""
    q = q_ref[0]                                   # (ts, D) bf16
    k = k_ref[0]
    v = v_ref[0]
    qp = jnp.dot(q, wq_ref[...], preferred_element_type=jnp.float32) + bq_ref[...]
    kp = jnp.dot(k, wk_ref[...], preferred_element_type=jnp.float32) + bk_ref[...]
    vp = jnp.dot(v, wv_ref[...], preferred_element_type=jnp.float32) + bv_ref[...]
    # Fold 1/sqrt(d_k) into Q: saves H multiplies over (tq, S) f32 per
    # attention step (scaling Q scales the scores identically).
    qp_ref[0] = (qp * scale).astype(qp_ref.dtype)
    kp_ref[0] = kp.astype(kp_ref.dtype)
    vp_ref[0] = vp.astype(vp_ref.dtype)


# ---------------------------------------------------------------------------
# Phase 2: flash-style multi-head attention over already-projected Q/K/V.
# ---------------------------------------------------------------------------
def _flash_mha_kernel(*refs, num_heads, d_k, has_mask):
    """One (batch, q-tile, kv-tile) step: online-softmax attention, all heads.

    refs (in order):
      q_ref  : (1, tq,  D)  bf16, 1/sqrt(d_k) already folded in
      k_ref  : (1, tkv, D)  bf16
      v_ref  : (1, tkv, D)  bf16
      [mask_ref : (1, Sm, tkv), Sm in {1, tq}; 1 = attend, 0 = masked]
      o_ref  : (1, tq, D)
      m_sc   : (H, tq, 1)   f32 running max
      l_sc   : (H, tq, 1)   f32 running denominator
      acc_sc : (H, tq, d_k) f32 running context
    """
    if has_mask:
        q_ref, k_ref, v_ref, mask_ref, o_ref, m_sc, l_sc, acc_sc = refs
    else:
        q_ref, k_ref, v_ref, o_ref, m_sc, l_sc, acc_sc = refs
        mask_ref = None

    kv = pl.program_id(2)

    @pl.when(kv == 0)
    def _():
        m_sc[...] = jnp.full(m_sc.shape, -jnp.inf, dtype=m_sc.dtype)
        l_sc[...] = jnp.zeros(l_sc.shape, dtype=l_sc.dtype)
        acc_sc[...] = jnp.zeros(acc_sc.shape, dtype=acc_sc.dtype)

    q = q_ref[0]                                   # (tq,  D) bf16
    k = k_ref[0]                                   # (tkv, D) bf16
    v = v_ref[0]                                   # (tkv, D) bf16

    if has_mask:
        m = mask_ref[0].astype(jnp.float32)        # (1|tq, tkv); 1 = attend
        bias = (1.0 - m) * -10000.0                # PyTorch-style additive mask

    # Small-H Python unroll; per-head temporaries go straight into scratch
    # slabs so live ranges stay modest.
    # TODO(synk): for large H, use a head grid axis (or lax.fori_loop with
    # pl.ds lane offsets) to bound live ranges instead of unrolling.
    for h in range(num_heads):
        lo = h * d_k
        qh = q[:, lo:lo + d_k]                     # (tq,  d_k)
        kh = k[:, lo:lo + d_k]                     # (tkv, d_k)
        vh = v[:, lo:lo + d_k]                     # (tkv, d_k)

        # scores = qh @ kh^T without materializing a transpose of kh.
        s = lax.dot_general(qh, kh, (((1,), (1,)), ((), ())),
                            preferred_element_type=jnp.float32)   # (tq, tkv)
        if has_mask:
            s = s + bias

        m_prev = m_sc[h]                                           # (tq, 1)
        m_new = jnp.maximum(m_prev, jnp.max(s, axis=-1, keepdims=True))
        alpha = jnp.exp(m_prev - m_new)
        p = jnp.exp(s - m_new)                                     # (tq, tkv)
        l_sc[h] = alpha * l_sc[h] + jnp.sum(p, axis=-1, keepdims=True)
        acc_sc[h] = alpha * acc_sc[h] + jnp.dot(
            p.astype(v.dtype), vh, preferred_element_type=jnp.float32)
        m_sc[h] = m_new

    @pl.when(kv == pl.num_programs(2) - 1)
    def _():
        # Dropout with p=0.0 (eval mode) is the identity.
        # TODO(synk): training-mode dropout (pltpu.prng_*) not implemented.
        for h in range(num_heads):
            lo = h * d_k
            inv = pl.reciprocal(l_sc[h], approx=True)              # (tq, 1)
            o_ref[0, :, lo:lo + d_k] = (acc_sc[h] * inv).astype(o_ref.dtype)


# ---------------------------------------------------------------------------
# Wrapper
# ---------------------------------------------------------------------------
def _vmem_limit_bytes(default=48 * 1024 * 1024):
    """Generation-aware scoped-VMEM limit: ~112 MiB on 128-MiB parts (v5e/v6e),
    ~48 MiB on v7x (64 MiB physical), else a safe default."""
    try:
        info = pltpu.get_tpu_info()
        cap = int(getattr(info, "vmem_capacity_bytes", 0) or 0)
        if cap > 0:
            return max(default, min(cap - 16 * 1024 * 1024, 112 * 1024 * 1024))
    except Exception:
        pass
    return default


def multi_head_attention(q, k, v, params, *, num_heads, mask=None,
                         q_tile=128, kv_tile=128, mxu_dtype=jnp.bfloat16):
    """Pallas forward of torchblocks MultiHeadAttention (dropout=0 / eval).

    q, k, v : (B, S, d_model)
    params  : dict with wq, wk, wv (d_model, d_model), input-major
              (y = x @ W + b, i.e. W = W_torch.T) and bq, bk, bv (d_model,).
    mask    : optional; (B, S) key mask or anything broadcastable to
              (B, S, S); 1 = attend, 0 = masked ((1-mask)*-1e4 semantics).
    Returns : (B, S, d_model) context layer.

    Tiles: 128 is a good default on v5e/v7x; q_tile=256 is worth trying on
    v6e (128 MiB VMEM, 256-wide MXU). kv_tile must be a multiple of 128.
    """
    B, S, D = q.shape
    assert k.shape == (B, S, D) and v.shape == (B, S, D), "q/k/v must share (B,S,D)"
    assert D % num_heads == 0
    assert q_tile % 8 == 0, "q_tile must be a multiple of 8"
    assert kv_tile % 128 == 0, "kv_tile must be a multiple of 128"
    d_k = D // num_heads
    scale = 1.0 / math.sqrt(d_k)
    out_dtype = q.dtype

    # ---- Tile selection + padding (never fall back to a huge whole-seq tile
    # silently: S not a multiple of the tile is padded and the pad is masked).
    tq = q_tile if S > q_tile else None      # None => whole (padded) sequence
    tkv = kv_tile if S > kv_tile else None
    mult = 1
    for t in (tq, tkv):
        if t is not None:
            mult = mult * t // math.gcd(mult, t)
    S_pad = int(pl.cdiv(S, mult)) * mult if mult > 1 else S
    if tq is None:
        tq = S_pad
    if tkv is None:
        tkv = S_pad
    pad = S_pad - S
    if pad:
        zpad = ((0, 0), (0, pad), (0, 0))
        q = jnp.pad(q, zpad)
        k = jnp.pad(k, zpad)
        v = jnp.pad(v, zpad)

    # ---- Mask prep: compact (B,1,S) key mask when possible; padded keys are
    # always masked out.
    has_mask = (mask is not None) or (pad > 0)
    mask3 = None
    mask_spec = None
    if has_mask:
        if mask is None:
            key_mask = jnp.ones((B, S), jnp.float32)
        else:
            mask = jnp.asarray(mask).astype(jnp.float32)
            key_mask = mask if (mask.ndim == 2 and mask.shape == (B, S)) else None
        if key_mask is not None:
            if pad:
                key_mask = jnp.pad(key_mask, ((0, 0), (0, pad)))
            mask3 = key_mask.reshape(B, 1, S_pad)
            mask_spec = pl.BlockSpec((1, 1, tkv), lambda b, qi, ki: (b, 0, ki))
        else:
            full = jnp.broadcast_to(mask, (B, S, S))
            if pad:
                full = jnp.pad(full, ((0, 0), (0, pad), (0, pad)))
            mask3 = full
            mask_spec = pl.BlockSpec((1, tq, tkv), lambda b, qi, ki: (b, qi, ki))

    # ---- dtype prep: bf16 activations/weights from HBM, f32 biases. --------
    qc = q.astype(mxu_dtype)
    kc = k.astype(mxu_dtype)
    vc = v.astype(mxu_dtype)
    wq = params["wq"].astype(mxu_dtype)
    wk = params["wk"].astype(mxu_dtype)
    wv = params["wv"].astype(mxu_dtype)
    bq = params["bq"].reshape(1, D).astype(jnp.float32)
    bk = params["bk"].reshape(1, D).astype(jnp.float32)
    bv = params["bv"].reshape(1, D).astype(jnp.float32)

    vmem_limit = _vmem_limit_bytes()

    # ------------------------ Phase 1: QKV projection -----------------------
    ts = tq
    ns = S_pad // ts
    rows_spec = pl.BlockSpec((1, ts, D), lambda b, si: (b, si, 0))
    const2d = lambda b, si: (0, 0)
    # TODO(synk): pipeline_mode=pl.Buffered(1) on the constant weight/bias
    # blocks would free another ~3*D*D bytes of VMEM once verified on-target.
    proj_in_specs = [
        rows_spec, rows_spec, rows_spec,              # q / k / v row tiles
        pl.BlockSpec((D, D), const2d),                # wq (resident)
        pl.BlockSpec((D, D), const2d),                # wk
        pl.BlockSpec((D, D), const2d),                # wv
        pl.BlockSpec((1, D), const2d),                # bq
        pl.BlockSpec((1, D), const2d),                # bk
        pl.BlockSpec((1, D), const2d),                # bv
    ]
    qp, kp, vp = pl.pallas_call(
        functools.partial(_qkv_proj_kernel, scale=scale),
        out_shape=(jax.ShapeDtypeStruct((B, S_pad, D), mxu_dtype),) * 3,
        grid_spec=pltpu.PrefetchScalarGridSpec(
            num_scalar_prefetch=0,
            grid=(B, ns),
            in_specs=proj_in_specs,
            out_specs=(rows_spec, rows_spec, rows_spec)),
        compiler_params=pltpu.CompilerParams(
            dimension_semantics=("parallel", "parallel"),
            vmem_limit_bytes=vmem_limit),
    )(qc, kc, vc, wq, wk, wv, bq, bk, bv)

    # ------------------------ Phase 2: attention -----------------------------
    nq = S_pad // tq
    nkv = S_pad // tkv
    attn_in_specs = [
        pl.BlockSpec((1, tq, D), lambda b, qi, ki: (b, qi, 0)),    # Q tile
        pl.BlockSpec((1, tkv, D), lambda b, qi, ki: (b, ki, 0)),   # K tile
        pl.BlockSpec((1, tkv, D), lambda b, qi, ki: (b, ki, 0)),   # V tile
    ]
    attn_args = [qp, kp, vp]
    if has_mask:
        attn_in_specs.append(mask_spec)
        attn_args.append(mask3)

    kernel = functools.partial(_flash_mha_kernel, num_heads=num_heads,
                               d_k=d_k, has_mask=has_mask)
    out = pl.pallas_call(
        kernel,
        out_shape=jax.ShapeDtypeStruct((B, S_pad, D), out_dtype),
        grid_spec=pltpu.PrefetchScalarGridSpec(
            num_scalar_prefetch=0,
            grid=(B, nq, nkv),
            in_specs=attn_in_specs,
            out_specs=pl.BlockSpec((1, tq, D), lambda b, qi, ki: (b, qi, 0)),
            scratch_shapes=[
                pltpu.VMEM((num_heads, tq, 1), jnp.float32),      # running max
                pltpu.VMEM((num_heads, tq, 1), jnp.float32),      # running denom
                pltpu.VMEM((num_heads, tq, d_k), jnp.float32),    # running ctx
            ]),
        compiler_params=pltpu.CompilerParams(
            dimension_semantics=("parallel", "parallel", "arbitrary"),
            vmem_limit_bytes=vmem_limit),
    )(*attn_args)

    return out[:, :S, :] if pad else out


# ---------------------------------------------------------------------------
# Pure-JAX f32 reference mirroring the PyTorch forward (dropout=0).
# ---------------------------------------------------------------------------
def _reference(q, k, v, params, *, num_heads, mask=None):
    B, S, D = q.shape
    d_k = D // num_heads

    def proj(x, w, b):
        y = x @ w + b
        return y.reshape(B, S, num_heads, d_k).transpose(0, 2, 1, 3)  # (B,H,S,d_k)

    Q = proj(q, params["wq"], params["bq"])
    K = proj(k, params["wk"], params["bk"])
    V = proj(v, params["wv"], params["bv"])

    scores = jnp.einsum("bhqd,bhkd->bhqk", Q, K) / math.sqrt(d_k)
    if mask is not None:
        mask = jnp.asarray(mask).astype(jnp.float32)
        if mask.ndim == 2:                       # (B, S) key mask
            bias = (1.0 - mask)[:, None, None, :] * -10000.0
        else:
            bias = ((1.0 - jnp.broadcast_to(mask, (B, S, S))) * -10000.0)[:, None]
        scores = scores + bias
    probs = jax.nn.softmax(scores, axis=-1)
    ctx = jnp.einsum("bhqk,bhkd->bhqd", probs, V)
    return ctx.transpose(0, 2, 1, 3).reshape(B, S, D)


def _init_params(key, d_model):
    """Deterministic init matching nn.Linear shapes (uniform +-1/sqrt(fan_in))."""
    bound = 1.0 / math.sqrt(d_model)
    keys = jax.random.split(key, 6)
    u = lambda kk, shape: jax.random.uniform(kk, shape, jnp.float32, -bound, bound)
    return {
        "wq": u(keys[0], (d_model, d_model)), "bq": u(keys[1], (d_model,)),
        "wk": u(keys[2], (d_model, d_model)), "bk": u(keys[3], (d_model,)),
        "wv": u(keys[4], (d_model, d_model)), "bv": u(keys[5], (d_model,)),
    }


if __name__ == "__main__":
    H = 4            # num heads (d_k = d_model / H)
    TOL = 3e-2       # bf16 MXU inputs + approx reciprocal vs f32 reference

    def make(bs, s, d, seed_key):
        ka, kb, kc, kp = jax.random.split(seed_key, 4)
        qq = jax.random.normal(ka, (bs, s, d), jnp.float32)
        kk = jax.random.normal(kb, (bs, s, d), jnp.float32)
        vv = jax.random.normal(kc, (bs, s, d), jnp.float32)
        return qq, kk, vv, _init_params(kp, d)

    root = jax.random.PRNGKey(0)
    seed1, seed2, seed3 = jax.random.split(root, 3)

    # 1) Small shapes, no mask (no zero-bias stream), single tile.
    q, k, v, params = make(2, 8, 32, seed1)
    out = jax.block_until_ready(multi_head_attention(q, k, v, params, num_heads=H))
    ref = _reference(q, k, v, params, num_heads=H)
    assert out.shape == (2, 8, 32)
    assert jnp.allclose(out, ref, atol=TOL, rtol=TOL), "mismatch (no mask)"

    # 2) Compact (B, S) key mask.
    key_mask = jnp.ones((2, 8), jnp.float32).at[1, -2:].set(0.0)
    out_m = jax.block_until_ready(
        multi_head_attention(q, k, v, params, num_heads=H, mask=key_mask))
    ref_m = _reference(q, k, v, params, num_heads=H, mask=key_mask)
    assert jnp.allclose(out_m, ref_m, atol=TOL, rtol=TOL), "mismatch (key mask)"

    # 3) Tiled grid (2 q-tiles x 2 kv-tiles): exercises the online-softmax
    #    KV loop + tiled key mask.
    q3, k3, v3, p3 = make(2, 256, 32, seed2)
    km3 = jnp.ones((2, 256), jnp.float32).at[0, -5:].set(0.0)
    out3 = jax.block_until_ready(
        multi_head_attention(q3, k3, v3, p3, num_heads=H, mask=km3))
    ref3 = _reference(q3, k3, v3, p3, num_heads=H, mask=km3)
    assert jnp.allclose(out3, ref3, atol=TOL, rtol=TOL), "mismatch (kv-tiled)"

    # 4) Sequence length not a multiple of the tile: pad + auto key mask.
    q4, k4, v4, p4 = make(2, 150, 32, seed3)
    out4 = jax.block_until_ready(
        multi_head_attention(q4, k4, v4, p4, num_heads=H))
    ref4 = _reference(q4, k4, v4, p4, num_heads=H)
    assert out4.shape == (2, 150, 32)
    assert jnp.allclose(out4, ref4, atol=TOL, rtol=TOL), "mismatch (padded S)"

    print("KERNEL_OK")
</pallas_src>

<mosaic_0001>
module attributes {stable_mosaic.version = 11 : i64} {
  func.func @_qkv_proj_kernel(%arg0: i32, %arg1: i32, %arg2: memref<1x8x32xbf16, #tpu.memory_space<vmem>>, %arg3: memref<1x8x32xbf16, #tpu.memory_space<vmem>>, %arg4: memref<1x8x32xbf16, #tpu.memory_space<vmem>>, %arg5: memref<32x32xbf16, #tpu.memory_space<vmem>>, %arg6: memref<32x32xbf16, #tpu.memory_space<vmem>>, %arg7: memref<32x32xbf16, #tpu.memory_space<vmem>>, %arg8: memref<1x32xf32, #tpu.memory_space<vmem>>, %arg9: memref<1x32xf32, #tpu.memory_space<vmem>>, %arg10: memref<1x32xf32, #tpu.memory_space<vmem>>, %arg11: memref<1x8x32xbf16, #tpu.memory_space<vmem>>, %arg12: memref<1x8x32xbf16, #tpu.memory_space<vmem>>, %arg13: memref<1x8x32xbf16, #tpu.memory_space<vmem>>) attributes {dimension_semantics = [#tpu.dimension_semantics<parallel>, #tpu.dimension_semantics<parallel>], iteration_bounds = array<i64: 2, 1>, scalar_prefetch = 0 : i64, scratch_operands = 0 : i64, tpu.core_type = #tpu.core_type<tc>, window_params = [{transform_indices = @transform_0, window_bounds = array<i64: 1, 8, 32>}, {transform_indices = @transform_1, window_bounds = array<i64: 1, 8, 32>}, {transform_indices = @transform_2, window_bounds = array<i64: 1, 8, 32>}, {pipeline_mode = #tpu.pipeline_mode<synchronous>, transform_indices = @transform_3, window_bounds = array<i64: 32, 32>}, {pipeline_mode = #tpu.pipeline_mode<synchronous>, transform_indices = @transform_4, window_bounds = array<i64: 32, 32>}, {pipeline_mode = #tpu.pipeline_mode<synchronous>, transform_indices = @transform_5, window_bounds = array<i64: 32, 32>}, {pipeline_mode = #tpu.pipeline_mode<synchronous>, transform_indices = @transform_6, window_bounds = array<i64: 1, 32>}, {pipeline_mode = #tpu.pipeline_mode<synchronous>, transform_indices = @transform_7, window_bounds = array<i64: 1, 32>}, {pipeline_mode = #tpu.pipeline_mode<synchronous>, transform_indices = @transform_8, window_bounds = array<i64: 1, 32>}, {transform_indices = @transform_9, window_bounds = array<i64: 1, 8, 32>}, {transform_indices = @transform_10, window_bounds = array<i64: 1, 8, 32>}, {transform_indices = @transform_11, window_bounds = array<i64: 1, 8, 32>}]} {
    %c0 = arith.constant 0 : index
    %c0_0 = arith.constant 0 : index
    %c0_1 = arith.constant 0 : index
    %0 = vector.load %arg2[%c0, %c0_0, %c0_1] : memref<1x8x32xbf16, #tpu.memory_space<vmem>>, vector<1x8x32xbf16>
    %1 = vector.shape_cast %0 : vector<1x8x32xbf16> to vector<8x32xbf16>
    %c0_2 = arith.constant 0 : index
    %c0_3 = arith.constant 0 : index
    %c0_4 = arith.constant 0 : index
    %2 = vector.load %arg3[%c0_2, %c0_3, %c0_4] : memref<1x8x32xbf16, #tpu.memory_space<vmem>>, vector<1x8x32xbf16>
    %3 = vector.shape_cast %2 : vector<1x8x32xbf16> to vector<8x32xbf16>
    %c0_5 = arith.constant 0 : index
    %c0_6 = arith.constant 0 : index
    %c0_7 = arith.constant 0 : index
    %4 = vector.load %arg4[%c0_5, %c0_6, %c0_7] : memref<1x8x32xbf16, #tpu.memory_space<vmem>>, vector<1x8x32xbf16>
    %5 = vector.shape_cast %4 : vector<1x8x32xbf16> to vector<8x32xbf16>
    %c0_8 = arith.constant 0 : index
    %c0_9 = arith.constant 0 : index
    %6 = vector.load %arg5[%c0_8, %c0_9] : memref<32x32xbf16, #tpu.memory_space<vmem>>, vector<32x32xbf16>
    %cst = arith.constant dense<0.000000e+00> : vector<8x32xf32>
    %7 = tpu.matmul %1, %6, %cst {dimension_numbers = #tpu.dot_dimension_numbers<[1], [0], [0], [1], [0, 0, 1, 1], [], []>} : vector<8x32xbf16>, vector<32x32xbf16>, vector<8x32xf32> -> vector<8x32xf32>
    %c0_10 = arith.constant 0 : index
    %c0_11 = arith.constant 0 : index
    %8 = vector.load %arg8[%c0_10, %c0_11] : memref<1x32xf32, #tpu.memory_space<vmem>>, vector<1x32xf32>
    %9 = vector.broadcast %8 : vector<1x32xf32> to vector<8x32xf32>
    %10 = arith.addf %7, %9 : vector<8x32xf32>
    %c0_12 = arith.constant 0 : index
    %c0_13 = arith.constant 0 : index
    %11 = vector.load %arg6[%c0_12, %c0_13] : memref<32x32xbf16, #tpu.memory_space<vmem>>, vector<32x32xbf16>
    %cst_14 = arith.constant dense<0.000000e+00> : vector<8x32xf32>
    %12 = tpu.matmul %3, %11, %cst_14 {dimension_numbers = #tpu.dot_dimension_numbers<[1], [0], [0], [1], [0, 0, 1, 1], [], []>} : vector<8x32xbf16>, vector<32x32xbf16>, vector<8x32xf32> -> vector<8x32xf32>
    %c0_15 = arith.constant 0 : index
    %c0_16 = arith.constant 0 : index
    %13 = vector.load %arg9[%c0_15, %c0_16] : memref<1x32xf32, #tpu.memory_space<vmem>>, vector<1x32xf32>
    %14 = vector.broadcast %13 : vector<1x32xf32> to vector<8x32xf32>
    %15 = arith.addf %12, %14 : vector<8x32xf32>
    %c0_17 = arith.constant 0 : index
    %c0_18 = arith.constant 0 : index
    %16 = vector.load %arg7[%c0_17, %c0_18] : memref<32x32xbf16, #tpu.memory_space<vmem>>, vector<32x32xbf16>
    %cst_19 = arith.constant dense<0.000000e+00> : vector<8x32xf32>
    %17 = tpu.matmul %5, %16, %cst_19 {dimension_numbers = #tpu.dot_dimension_numbers<[1], [0], [0], [1], [0, 0, 1, 1], [], []>} : vector<8x32xbf16>, vector<32x32xbf16>, vector<8x32xf32> -> vector<8x32xf32>
    %c0_20 = arith.constant 0 : index
    %c0_21 = arith.constant 0 : index
    %18 = vector.load %arg10[%c0_20, %c0_21] : memref<1x32xf32, #tpu.memory_space<vmem>>, vector<1x32xf32>
    %19 = vector.broadcast %18 : vector<1x32xf32> to vector<8x32xf32>
    %20 = arith.addf %17, %19 : vector<8x32xf32>
    %cst_22 = arith.constant 0.353553385 : f32
    %21 = vector.broadcast %cst_22 : f32 to vector<8x32xf32>
    %22 = arith.mulf %10, %21 : vector<8x32xf32>
    %23 = arith.truncf %22 : vector<8x32xf32> to vector<8x32xbf16>
    %c0_23 = arith.constant 0 : index
    %c0_24 = arith.constant 0 : index
    %c0_25 = arith.constant 0 : index
    %24 = vector.load %arg11[%c0_23, %c0_24, %c0_25] : memref<1x8x32xbf16, #tpu.memory_space<vmem>>, vector<1x8x32xbf16>
    %25 = vector.shape_cast %24 : vector<1x8x32xbf16> to vector<8x32xbf16>
    %26 = vector.shape_cast %23 : vector<8x32xbf16> to vector<1x8x32xbf16>
    tpu.vector_store %arg11[%c0_23, %c0_24, %c0_25], %26 {strides = array<i32>} : memref<1x8x32xbf16, #tpu.memory_space<vmem>>, vector<1x8x32xbf16>,
    %27 = arith.truncf %15 : vector<8x32xf32> to vector<8x32xbf16>
    %c0_26 = arith.constant 0 : index
    %c0_27 = arith.constant 0 : index
    %c0_28 = arith.constant 0 : index
    %28 = vector.load %arg12[%c0_26, %c0_27, %c0_28] : memref<1x8x32xbf16, #tpu.memory_space<vmem>>, vector<1x8x32xbf16>
    %29 = vector.shape_cast %28 : vector<1x8x32xbf16> to vector<8x32xbf16>
    %30 = vector.shape_cast %27 : vector<8x32xbf16> to vector<1x8x32xbf16>
    tpu.vector_store %arg12[%c0_26, %c0_27, %c0_28], %30 {strides = array<i32>} : memref<1x8x32xbf16, #tpu.memory_space<vmem>>, vector<1x8x32xbf16>,
    %31 = arith.truncf %20 : vector<8x32xf32> to vector<8x32xbf16>
    %c0_29 = arith.constant 0 : index
    %c0_30 = arith.constant 0 : index
    %c0_31 = arith.constant 0 : index
    %32 = vector.load %arg13[%c0_29, %c0_30, %c0_31] : memref<1x8x32xbf16, #tpu.memory_space<vmem>>, vector<1x8x32xbf16>
    %33 = vector.shape_cast %32 : vector<1x8x32xbf16> to vector<8x32xbf16>
    %34 = vector.shape_cast %31 : vector<8x32xbf16> to vector<1x8x32xbf16>
    tpu.vector_store %arg13[%c0_29, %c0_30, %c0_31], %34 {strides = array<i32>} : memref<1x8x32xbf16, #tpu.memory_space<vmem>>, vector<1x8x32xbf16>,
    return
  }
  func.func @transform_0(%arg0: i32, %arg1: i32) -> (i32, i32, i32) {
    %c0_i32 = arith.constant 0 : i32
    %c0_i32_0 = arith.constant 0 : i32
    return %arg0, %arg1, %c0_i32 : i32, i32, i32
  }
  func.func @transform_1(%arg0: i32, %arg1: i32) -> (i32, i32, i32) {
    %c0_i32 = arith.constant 0 : i32
    %c0_i32_0 = arith.constant 0 : i32
    return %arg0, %arg1, %c0_i32 : i32, i32, i32
  }
  func.func @transform_2(%arg0: i32, %arg1: i32) -> (i32, i32, i32) {
    %c0_i32 = arith.constant 0 : i32
    %c0_i32_0 = arith.constant 0 : i32
    return %arg0, %arg1, %c0_i32 : i32, i32, i32
  }
  func.func @transform_3(%arg0: i32, %arg1: i32) -> (i32, i32) {
    %c0_i32 = arith.constant 0 : i32
    %c0_i32_0 = arith.constant 0 : i32
    %c0_i32_1 = arith.constant 0 : i32
    return %c0_i32, %c0_i32_0 : i32, i32
  }
  func.func @transform_4(%arg0: i32, %arg1: i32) -> (i32, i32) {
    %c0_i32 = arith.constant 0 : i32
    %c0_i32_0 = arith.constant 0 : i32
    %c0_i32_1 = arith.constant 0 : i32
    return %c0_i32, %c0_i32_0 : i32, i32
  }
  func.func @transform_5(%arg0: i32, %arg1: i32) -> (i32, i32) {
    %c0_i32 = arith.constant 0 : i32
    %c0_i32_0 = arith.constant 0 : i32
    %c0_i32_1 = arith.constant 0 : i32
    return %c0_i32, %c0_i32_0 : i32, i32
  }
  func.func @transform_6(%arg0: i32, %arg1: i32) -> (i32, i32) {
    %c0_i32 = arith.constant 0 : i32
    %c0_i32_0 = arith.constant 0 : i32
    %c0_i32_1 = arith.constant 0 : i32
    return %c0_i32, %c0_i32_0 : i32, i32
  }
  func.func @transform_7(%arg0: i32, %arg1: i32) -> (i32, i32) {
    %c0_i32 = arith.constant 0 : i32
    %c0_i32_0 = arith.constant 0 : i32
    %c0_i32_1 = arith.constant 0 : i32
    return %c0_i32, %c0_i32_0 : i32, i32
  }
  func.func @transform_8(%arg0: i32, %arg1: i32) -> (i32, i32) {
    %c0_i32 = arith.constant 0 : i32
    %c0_i32_0 = arith.constant 0 : i32
    %c0_i32_1 = arith.constant 0 : i32
    return %c0_i32, %c0_i32_0 : i32, i32
  }
  func.func @transform_9(%arg0: i32, %arg1: i32) -> (i32, i32, i32) {
    %c0_i32 = arith.constant 0 : i32
    %c0_i32_0 = arith.constant 0 : i32
    return %arg0, %arg1, %c0_i32 : i32, i32, i32
  }
  func.func @transform_10(%arg0: i32, %arg1: i32) -> (i32, i32, i32) {
    %c0_i32 = arith.constant 0 : i32
    %c0_i32_0 = arith.constant 0 : i32
    return %arg0, %arg1, %c0_i32 : i32, i32, i32
  }
  func.func @transform_11(%arg0: i32, %arg1: i32) -> (i32, i32, i32) {
    %c0_i32 = arith.constant 0 : i32
    %c0_i32_0 = arith.constant 0 : i32
    return %arg0, %arg1, %c0_i32 : i32, i32, i32
  }
}

</mosaic_0001>

<bundles_post_ra>
// kernel: tpu_custom_call.1
= control target key start
LH: loop header
LB: loop body
LE: loop exit
PB: predicated region body
PF: predicated region fallthrough
CT: control target
= control target key end

     0   :  { %s1995_s0 = inlined_call_operand.hbm [shape: bf16[2,8,32], index: 0, kind: input, shape index: {}]   ;;  %s1996_s1 = inlined_call_operand.hbm [shape: bf16[2,8,32], index: 1, kind: input, shape index: {}]   ;;  %s1997_s2 = inlined_call_operand.hbm [shape: bf16[2,8,32], index: 2, kind: input, shape index: {}]   ;;  %s1998_s3 = inlined_call_operand.hbm [shape: bf16[32,32], index: 3, kind: input, shape index: {}]   ;;  %s1999_s4 = inlined_call_operand.hbm [shape: bf16[32,32], index: 4, kind: input, shape index: {}]   ;;  %s2000_s5 = inlined_call_operand.vmem [shape: bf16[32,32], index: 5, kind: input, shape index: {}]   ;;  %s2001_s6 = inlined_call_operand.vmem [shape: f32[1,32], index: 6, kind: input, shape index: {}]   ;;  %s2002_s7 = inlined_call_operand.vmem [shape: f32[1,32], index: 7, kind: input, shape index: {}]   ;;  %s2003_s8 = inlined_call_operand.vmem [shape: f32[1,32], index: 8, kind: input, shape index: {}]   ;;  %s2004_s9 = inlined_call_operand.hbm [shape: bf16[2,8,32], index: 9, kind: output, shape index: {0}]   ;;  %s2005_s10 = inlined_call_operand.hbm [shape: bf16[2,8,32], index: 10, kind: output, shape index: {1}]   ;;  %s2006_s11 = inlined_call_operand.hbm [shape: bf16[2,8,32], index: 11, kind: output, shape index: {2}]  }
   0x1   :  { %2030 = sst [smem:[#allocation26_spill]] %s1996_s1 }
   0x2   :  { %2031 = sst [smem:[#allocation27_spill]] %s1998_s3 }
   0x3   :  { %2032 = sst [smem:[#allocation28_spill]] %s1999_s4 }
   0x4   :  { %2033 = sst [smem:[#allocation29_spill]] %s2003_s8 }
   0x5   :  { %2034 = sst [smem:[#allocation30_spill]] %s2004_s9 }
   0x6   :  { %2035 = sst [smem:[#allocation31_spill]] %s2006_s11 }
   0x7   :  { %17 = vsyncpa [#allocation3], 0 }
   0x8   :  { %19 = vsyncpa [#allocation3 + $0x1], 0 }
   0x9   :  { %20 = vsyncpa [#allocation6], 0 }
   0xa   :  { %22 = vsyncpa [#allocation6 + $0x1], 0 }
   0xb   :  { %23 = vsyncpa [#allocation9], 0 }
   0xc   :  { %24 = vsyncpa [#allocation4], 0 }
   0xd   :  { %26 = vsyncpa [#allocation4 + $0x1], 0 }
   0xe   :  { %27 = vsyncpa [#allocation13], 0 }
   0xf   :  { %29 = vsyncpa [#allocation13 + $0x1], 0  ;;  %s1575_s17 = smov 0   ;;  %s1577_s18 = smov 0  }
  0x10   :  { %s1579_s19 = smov 0   ;;  %s1581_s20 = smov 0  }
  0x11   :  { %s1583_s21 = smov 0   ;;  %s1585_s22 = smov 0  }
  0x12 LB: > { %2036 = sst [smem:[#allocation20_spill]] %s1481_s17  ;;  %s1606_s23 = sadd.s32 4294967295, %s1501_s22   ;;  %s1501_s22 = sphi %s1585_s22, %s35_s22   ;;  %s1497_s21 = sphi %s1583_s21, %s2079_s21   ;;  %s1493_s20 = sphi %s1581_s20, %s2078_s20   ;;  %s1489_s19 = sphi %s1579_s19, %s2082_s19   ;;  %s1485_s18 = sphi %s1577_s18, %s2081_s18   ;;  %s1481_s17 = sphi %s1575_s17, %s2080_s17  }
  0x13   : > { %2037 = sst [smem:[#allocation21_spill]] %s1497_s21  ;;  %s2007_s24 = sadd.s32 4294967294, %s1501_s22  }
  0x14   : > { %2038 = sst [smem:[#allocation22_spill]] %s1501_s22  ;;  %p69_p0 = scmp.ne.s32.totalorder %s1485_s18, %s1481_s17 }
  0x15   : > { %p2010_p1 = scmp.eq.s32.totalorder %s1606_s23, 0  ;;  %p283_p3 = scmp.eq.s32.totalorder %s2007_s24, 1 }
  0x16   : > { %p1020_p5 = scmp.ge.s32.totalorder %s1501_s22, 1  ;;  %p346_p7 = scmp.lt.s32.totalorder %s1501_s22, 3 }
  0x17   : > { %p1617_p4 = por %p2010_p1, %p69_p0  ;;  %p1622_p6 = por %p283_p3, %p69_p0 }
  0x18   : > { %p1627_p8 = pnand %p1020_p5, %p346_p7  ;;  %s1503_s28 = smov [#allocation8]  }
  0x19   : > { %s2039_s25 = scalar_select %p1617_p4, 1, 0 }
  0x1a   : > { %s2040_s26 = scalar_select %p1622_p6, 1, 0 }
  0x1b   : > { %s2042_s27 = scalar_select %p1627_p8, 1, 0 }
  0x1c   : > { %2041 = sst [smem:[#allocation23_spill]] %s2040_s26  ;;  %s358_s29 = sshll.u32 %s1503_s28, 4  ;;  %s359_s29 = int_to_ptr.vmem [resolvable:$true] %s358_s29 }
  0x1d   : > { %p1112_p9 = pneg %p1627_p8  ;;  %s47_s12 = sadd.s32 1, %s1497_s21 }
  0x1e   : > { %s2044_s3 = sld [smem:[#allocation27_spill]] }
  0x1f   : > { %p1636_p11 = pnand %p1112_p9, %p2010_p1 }
  0x21   : > { %s2043_s30 = scalar_select %p1636_p11, 1, 0 }
  0x22   : > { %p2022_p13 = pneg %p1636_p11 }
  0x24   : > { %s1205_s15 = scalar_lea.hbm %s2044_s3, 256 }
  0x25   : > { %p1206_p12 = scmp.ne.s32.totalorder %s2044_s3, %s1205_s15  ;;  %p1212_p5 = scmp.lt.u32.totalorder %s1205_s15, %s2044_s3 }
  0x27   : > { %p1208_p0 = pnand %p2022_p13, %p1206_p12 }
  0x29   : > { %p1209_p3 = pneg %p1208_p0 }
  0x2b   : > { %p1214_p7 = pnand %p1212_p5, %p1209_p3 }
  0x2d   : > { %1217 = shalt.err (!%p1214_p7)
}
  0x2e   : > { %s1218_s17 = scalar_lea.vmem %s359_s29, 256  ;;  %p1226_p2 = scmp.lt.s32.totalorder %s359_s29, %s359_s29 }
  0x2f   : > { %p1219_p9 = scmp.ne.s32.totalorder %s359_s29, %s1218_s17  ;;  %p1227_p6 = scmp.lt.s32.totalorder %s1218_s17, %s1218_s17 }
  0x31   : > { %p1221_p10 = pnand %p1219_p9, %p2022_p13  ;;  %p1228_p4 = por %p1227_p6, %p1226_p2 }
  0x33   : > { %p1222_p1 = pneg %p1221_p10 }
  0x35   : > { %p1229_p8 = pnand %p1228_p4, %p1222_p1 }
  0x37   : > { %1232 = shalt.err (!%p1229_p8)
}
  0x38   : > { %s2013_s24 = smov 64   ;;  %s2014_s26 = smov 4  }
  0x39   : > { %1115 = dma.hbm_to_vmem [thread:$0]  (!%p1636_p11), %s2044_s3, 256, %s359_s29, [#allocation9], %s2013_s24, %s2013_s24, %s2014_s26  }
  0x3a   : > { %p49_p1 = scmp.ge.s32.totalorder %s47_s12, 2  ;;  %s56_s14 = sadd.s32 1, %s1489_s19 }
  0x3b   : > { %p63_p2 = scmp.ne.s32.totalorder %s1489_s19, %s1485_s18  ;;  %p64_p4 = scmp.eq.s32.totalorder %s1501_s22, 0 }
  0x3c   : > { %s2084_s12 = smov (%p49_p1, %s47_s12), 0  ;;  %p2046_p8 = scmp.eq.s32.totalorder %s1606_s23, 1 }
  0x3d   : > { %2045 = sst [smem:[#allocation24_spill]] %s2084_s12  ;;  %p65_p6 = por %p64_p4, %p63_p2 }
  0x3e   : > { %p1674_p10 = por %p2046_p8, %p63_p2  ;;  %s51_s16 = ssub.s32 %s1497_s21, %s2084_s12 }
  0x3f   : > { %p1141_p12 = scmp.lt.s32.totalorder %s1501_s22, 2  ;;  %p54_p0 = scmp.eq.s32.totalorder %s51_s16, 0 }
  0x40   : > { %s2047_s15 = scalar_select %p1674_p10, 1, 0 }
  0x41   : > { %s2016_s28 = sand.u32 1, %s1489_s19   ;;  %s1687_s17 = sshll.u32 %s1497_s21, 6 }
  0x42   : > { %s1684_s29 = sshll.u32 %s2016_s28, 2  ;;  %p1692_p3 = pnand %p1141_p12, %p65_p6 }
  0x43   : > { %s1690_s13 = scalar_select %p54_p0, %s1489_s19, %s56_s14  }
  0x44   : > { %s2049_s24 = scalar_select %p1692_p3, 1, 0 }
  0x45   : > { %2048 = sst [smem:[#allocation25_spill]] %s1690_s13  ;;  %s416_s26 = sand.u32 1, %s1501_s22  }
  0x46   : > { %s2050_s1 = sld [smem:[#allocation26_spill]]  ;;  %s420_s28 = scalar_lea.vmem [#allocation5], %s1684_s29 }
  0x47   : > { %s428_s21 = sshll.u32 %s420_s28, 4  ;;  %s1506_s14 = smov [#allocation10]   ;;  %s1704_s21 = int_to_ptr.vmem [resolvable:$true] %s428_s21 }
  0x48   : > { %s1706_s13 = sshll.u32 %s1506_s14, 4  ;;  %s1708_s11 = scalar_lea.sflag [#allocation6], %s416_s26  ;;  %s372_s13 = int_to_ptr.vmem [resolvable:$true] %s1706_s13 }
  0x49   : > { %p1714_p7 = pneg %p1692_p3 }
  0x4b   : > { %s2051_s3 = scalar_select %p1714_p7, 1, 0 }
  0x4c   : > { %s1701_s16 = scalar_lea.hbm %s2050_s1, %s1687_s17  ;;  %s1238_s22 = scalar_lea.hbm %s2050_s1, 128 }
  0x4d   : > { %s1233_s9 = scalar_lea.hbm %s1701_s16, 64  ;;  %p1239_p2 = scmp.lt.u32.totalorder %s1701_s16, %s2050_s1 }
  0x4e   : > { %p1234_p5 = scmp.ne.s32.totalorder %s1701_s16, %s1233_s9  ;;  %p1240_p4 = scmp.lt.u32.totalorder %s1238_s22, %s1233_s9 }
  0x4f   : > { %p1242_p8 = scmp.lt.u32.totalorder %s1233_s9, %s1701_s16 }
  0x50   : > { %p1236_p9 = pnand %p1714_p7, %p1234_p5  ;;  %p1241_p6 = por %p1240_p4, %p1239_p2 }
  0x52   : > { %p1237_p1 = pneg %p1236_p9  ;;  %p1243_p12 = por %p1242_p8, %p1241_p6 }
  0x54   : > { %p1244_p0 = pnand %p1243_p12, %p1237_p1 }
  0x56   : > { %1247 = shalt.err (!%p1244_p0)
}
  0x57   : > { %s1248_s26 = scalar_lea.vmem %s1704_s21, 64  ;;  %s1507_s12 = smov [#allocation5]  }
  0x58   : > { %p1249_p5 = scmp.ne.s32.totalorder %s1704_s21, %s1248_s26  ;;  %s1253_s28 = sshll.u32 %s1507_s12, 4  ;;  %s1254_s28 = int_to_ptr.vmem [resolvable:$false] %s1253_s28 }
  0x59   : > { %s1255_s8 = scalar_lea.vmem %s1254_s28, 128  ;;  %p1256_p10 = scmp.lt.s32.totalorder %s1704_s21, %s1254_s28 }
  0x5a   : > { %p1251_p9 = pnand %p1249_p5, %p1714_p7  ;;  %p1257_p11 = scmp.lt.s32.totalorder %s1255_s8, %s1248_s26 }
  0x5c   : > { %p1252_p13 = pneg %p1251_p9  ;;  %p1258_p2 = por %p1257_p11, %p1256_p10 }
  0x5e   : > { %p1259_p4 = pnand %p1258_p2, %p1252_p13 }
  0x60   : > { %1262 = shalt.err (!%p1259_p4)
}
  0x61   : > { %1125 = dma.hbm_to_vmem [thread:$0]  (!%p1692_p3), %s1701_s16, 64, %s1704_s21, %s1708_s11  }
  0x62   : > { %s2052_s4 = sld [smem:[#allocation28_spill]]  ;;  %p2053_p11 = scmp.ne.s32.totalorder %s2043_s30, 0 }
  0x64   : > { %p2054_p13 = pneg %p2053_p11 }
  0x68   : > { %s1263_s14 = scalar_lea.hbm %s2052_s4, 256 }
  0x69   : > { %p1264_p1 = scmp.ne.s32.totalorder %s2052_s4, %s1263_s14  ;;  %p1270_p8 = scmp.lt.u32.totalorder %s1263_s14, %s2052_s4 }
  0x6b   : > { %p1266_p10 = pnand %p1264_p1, %p2054_p13 }
  0x6d   : > { %p1267_p6 = pneg %p1266_p10 }
  0x6f   : > { %p1272_p12 = pnand %p1270_p8, %p1267_p6 }
  0x71   : > { %1275 = shalt.err (!%p1272_p12)
}
  0x72   : > { %s1276_s21 = scalar_lea.vmem %s372_s13, 256  ;;  %p2055_p5 = pmov %p2054_p13 }
  0x73   : > { %p1277_p0 = scmp.ne.s32.totalorder %s372_s13, %s1276_s21  ;;  %p1284_p4 = scmp.lt.s32.totalorder %s372_s13, %s372_s13 }
  0x74   : > { %p1285_p3 = scmp.lt.s32.totalorder %s1276_s21, %s1276_s21 }
  0x75   : > { %p1279_p9 = pnand %p1277_p0, %p2055_p5 }
  0x76   : > { %p1286_p7 = por %p1285_p3, %p1284_p4 }
  0x77   : > { %p1280_p2 = pneg %p1279_p9 }
  0x79   : > { %p1287_p1 = pnand %p1286_p7, %p1280_p2 }
  0x7b   : > { %1290 = shalt.err (!%p1287_p1)
}
  0x7c   : > { %s2056_s1 = smov 4   ;;  %s2057_s16 = smov 64  }
  0x7d   : > { %1118 = dma.hbm_to_vmem [thread:$0]  (!%p2053_p11), %s2052_s4, 256, %s372_s13, [#allocation9], %s2057_s16, %s2057_s16, %s2056_s1  }
  0x7e   : > { %s1766_s12 = scalar_lea.hbm %s1995_s0, %s1687_s17  ;;  %s401_s30 = scalar_lea.vmem [#allocation2], %s1684_s29 }
  0x7f   : > { %s409_s26 = sshll.u32 %s401_s30, 4  ;;  %s1775_s8 = scalar_lea.hbm %s1997_s2, %s1687_s17  ;;  %s1769_s26 = int_to_ptr.vmem [resolvable:$true] %s409_s26 }
  0x80   : > { %s2058_s9 = sand.u32 1, %s1489_s19   ;;  %s1291_s1 = scalar_lea.hbm %s1766_s12, 64 }
  0x81   : > { %s398_s13 = scalar_lea.sflag [#allocation3], %s2058_s9  ;;  %p1292_p3 = scmp.ne.s32.totalorder %s1766_s12, %s1291_s1 }
  0x82   : > { %p2059_p7 = scmp.ne.s32.totalorder %s2051_s3, 0  ;;  %s1296_s14 = scalar_lea.hbm %s1995_s0, 128 }
  0x83   : > { %p1297_p10 = scmp.lt.u32.totalorder %s1766_s12, %s1995_s0  ;;  %p1298_p6 = scmp.lt.u32.totalorder %s1296_s14, %s1291_s1 }
  0x84   : > { %p1294_p11 = pnand %p1292_p3, %p2059_p7  ;;  %p1300_p12 = scmp.lt.u32.totalorder %s1291_s1, %s1766_s12 }
  0x85   : > { %p1299_p8 = por %p1298_p6, %p1297_p10 }
  0x86   : > { %p1295_p13 = pneg %p1294_p11 }
  0x87   : > { %p1301_p0 = por %p1300_p12, %p1299_p8 }
  0x89   : > { %p1302_p5 = pnand %p1301_p0, %p1295_p13 }
  0x8b   : > { %1305 = shalt.err (!%p1302_p5)
}
  0x8c   : > { %s1306_s17 = scalar_lea.vmem %s1769_s26, 64  ;;  %s1508_s28 = smov [#allocation2]  }
  0x8d   : > { %p1307_p9 = scmp.ne.s32.totalorder %s1769_s26, %s1306_s17  ;;  %s1311_s21 = sshll.u32 %s1508_s28, 4  ;;  %s1312_s21 = int_to_ptr.vmem [resolvable:$false] %s1311_s21 }
  0x8e   : > { %s1313_s4 = scalar_lea.vmem %s1312_s21, 128  ;;  %p1314_p1 = scmp.lt.s32.totalorder %s1769_s26, %s1312_s21 }
  0x8f   : > { %p1309_p2 = pnand %p1307_p9, %p2059_p7  ;;  %p1315_p3 = scmp.lt.s32.totalorder %s1313_s4, %s1306_s17 }
  0x91   : > { %p1310_p4 = pneg %p1309_p2  ;;  %p1316_p11 = por %p1315_p3, %p1314_p1 }
  0x93   : > { %p1317_p10 = pnand %p1316_p11, %p1310_p4 }
  0x95   : > { %1320 = shalt.err (!%p1317_p10)
}
  0x96   : > { %p2060_p13 = scmp.ne.s32.totalorder %s2049_s24, 0  ;;  %s439_s9 = scalar_lea.vmem [#allocation7], %s1684_s29 }
  0x97   : > { %s447_s1 = sshll.u32 %s439_s9, 4  ;;  %s1321_s16 = scalar_lea.hbm %s1775_s8, 64  ;;  %s448_s1 = int_to_ptr.vmem [resolvable:$true] %s447_s1 }
  0x98   : > { %1122 = dma.hbm_to_vmem [thread:$0]  (!%p2060_p13), %s1766_s12, 64, %s1769_s26, %s398_s13  }
  0x99   : > { %p1322_p6 = scmp.ne.s32.totalorder %s1775_s8, %s1321_s16  ;;  %s1326_s30 = scalar_lea.hbm %s1997_s2, 128 }
  0x9a   : > { %p1327_p0 = scmp.lt.u32.totalorder %s1775_s8, %s1997_s2  ;;  %p1328_p5 = scmp.lt.u32.totalorder %s1326_s30, %s1321_s16 }
  0x9b   : > { %p1324_p8 = pnand %p1322_p6, %p2059_p7  ;;  %p1330_p2 = scmp.lt.u32.totalorder %s1321_s16, %s1775_s8 }
  0x9c   : > { %p1329_p9 = por %p1328_p5, %p1327_p0 }
  0x9d   : > { %p1325_p12 = pneg %p1324_p8 }
  0x9e   : > { %p1331_p4 = por %p1330_p2, %p1329_p9 }
  0xa0   : > { %p1332_p1 = pnand %p1331_p4, %p1325_p12 }
  0xa2   : > { %1335 = shalt.err (!%p1332_p1)
}
  0xa3   : > { %s1336_s29 = scalar_lea.vmem %s448_s1, 64  ;;  %s1509_s12 = smov [#allocation7]  }
  0xa4   : > { %p1337_p3 = scmp.ne.s32.totalorder %s448_s1, %s1336_s29  ;;  %s1341_s26 = sshll.u32 %s1509_s12, 4  ;;  %s1342_s26 = int_to_ptr.vmem [resolvable:$false] %s1341_s26 }
  0xa5   : > { %s1343_s13 = scalar_lea.vmem %s1342_s26, 128  ;;  %p1344_p6 = scmp.lt.s32.totalorder %s448_s1, %s1342_s26 }
  0xa6   : > { %p1339_p11 = pnand %p1337_p3, %p2059_p7  ;;  %p1345_p8 = scmp.lt.s32.totalorder %s1343_s13, %s1336_s29 }
  0xa8   : > { %p1340_p10 = pneg %p1339_p11  ;;  %p1346_p13 = por %p1345_p8, %p1344_p6 }
  0xaa   : > { %p1347_p0 = pnand %p1346_p13, %p1340_p10 }
  0xac   : > { %1350 = shalt.err (!%p1347_p0)
}
  0xad   : > { %p2061_p5 = scmp.ne.s32.totalorder %s2049_s24, 0  ;;  %p2062_p12 = scmp.ne.s32.totalorder %s2042_s27, 0 }
  0xae   : > { %s1822_s3 = sand.u32 (!%p2062_p12), 1, %s1485_s18   ;;  %p2063_p7 = scmp.ne.s32.totalorder (!%p2062_p12), %s2039_s25, 0 }
  0xaf   : > { %1128 = dma.hbm_to_vmem [thread:$0]  (!%p2061_p5), %s1775_s8, 64, %s448_s1, %s1708_s11  }
  0xb0   : > { %456 = sbr.rel (%p2062_p12) target bundleno = 479 (0x1df), region = 56  ;;  %s1825_s21 = sshll.u32 (!%p2062_p12), %s1822_s3, 2 }
  0xb1   : > { %s459_s4 = scalar_lea.sflag (!%p2062_p12), [#allocation3], %s1822_s3  ;;  %s462_s9 = scalar_lea.vmem (!%p2062_p12), [#allocation2], %s1825_s21 }
  0xb7   : > { %1460 = dma.done.wait (%p2063_p7), %s459_s4, 64  }
  0xb8   : > { %1462 = vsyncadd (%p2063_p7), %s459_s4, 4294967232  ;;  %s467_s11 = sand.u32 1, %s1606_s23   ;;  %s471_s24 = scalar_lea.vmem [#allocation5], %s1825_s21 }
  0xb9   : > { %s468_s27 = scalar_lea.sflag [#allocation6], %s467_s11 }
  0xba   : > { %1464 = dma.done.wait (%p2063_p7), %s468_s27, 128  }
  0xbb   : > { %1466 = vsyncadd (%p2063_p7), %s468_s27, 4294967168  ;;  %s480_s8 = scalar_lea.vmem [#allocation7], %s1825_s21  ;;  %p2064_p13 = scmp.eq.s32.totalorder %s1606_s23, 0 }
  0xbd   : > { %1468 = dma.done.wait (%p2064_p13), [#allocation9], 512   ;;  %p2065_p9 = pmov %p2064_p13 }
  0xbe   : > { %v1510_v0 = vmov 0.0   ;;  %vm1511_vm0 = vmmov 0   ;;  %v1199_v1 = vld [vmem:[#allocation8] sm:$0xff]   ;;  %v1200_v2 = vld [vmem:[#allocation8 + $0x8] sm:$0xff]   ;;  %v1201_v3 = vld [vmem:[#allocation10] sm:$0xff]   ;;  %vm574_vm1 = vcmask 261120  }
  0xbf   : > { %1470 = vsyncadd (%p2065_p9), [#allocation9], 4294966784  ;;  %1068 = vmatprep.subr.bf16.mxu0 %v1510_v0  ;;  %1076 = vmatprep.subr.bf16.mxu1 %v1510_v0  ;;  %v1203_v4 = vld [vmem:[#allocation10 + $0x8] sm:$0xff]   ;;  %v548_v5 = vld [vmem:[%s462_s9] sm:$0xf]  ;;  %s1864_s29 = sshll.u32 %s1493_s20, 6 }
  0xc0   : > { %1072 = vmatprep.mubr.msk.bf16.mxu0 %vm1511_vm0, %v1510_v0  ;;  %1080 = vmatprep.mubr.msk.bf16.mxu1 %vm1511_vm0, %v1510_v0  ;;  %v1202_v6 = vld [vmem:[%s2000_s5] sm:$0xff]   ;;  %v549_v7 = vld [vmem:[%s471_s24] sm:$0xf]  ;;  %v1204_v8 = vld [vmem:[%s2000_s5 + $0x8] sm:$0xff]   ;;  %s539_s12 = scalar_lea.vmem [#allocation12], %s1825_s21  ;;  %s532_s13 = scalar_lea.vmem [#allocation11], %s1825_s21 }
  0xc1   : > { %1069 = vmatpush3.bf16.msra.mxu0 %v1199_v1  ;;  %1077 = vmatpush3.bf16.msra.mxu1 %v1201_v3  ;;  %v550_v9 = vld [vmem:[%s480_s8] sm:$0xf]  ;;  %s797_s26 = sshll.u32 %s539_s12, 4  ;;  %s783_s4 = sshll.u32 %s532_s13, 4  ;;  %vm752_vm2 = vcmask 257024   ;;  %s1874_s26 = int_to_ptr.vmem [resolvable:$true] %s797_s26  ;;  %s1885_s4 = int_to_ptr.vmem [resolvable:$true] %s783_s4 }
  0xc2   : > { %1070 = vmatprep.subr.bf16.mxu0 %v1510_v0  ;;  %1078 = vmatprep.subr.bf16.mxu1 %v1510_v0  ;;  %v1039_v10 = vld [vmem:[%s2001_s6] ss:$0 sm:$0xff]  ;;  %s1872_s27 = scalar_lea.hbm %s2005_s10, %s1864_s29  ;;  %s2066_s25 = sld [smem:[#allocation29_spill]] }
  0xc3   : > { %v1043_v12 = vld [vmem:[%s2002_s7] ss:$0 sm:$0xff]  ;;  %s2067_s22 = sld [smem:[#allocation30_spill]]  ;;  %s546_s17 = scalar_lea.vmem [#allocation14], %s1825_s21 }
  0xc4   : > { %s1892_s28 = sshll.u32 %s546_s17, 4  ;;  %s1896_s9 = scalar_lea.sflag [#allocation13], %s467_s11  ;;  %s812_s28 = int_to_ptr.vmem [resolvable:$true] %s1892_s28 }
  0xc5   : > { %1071 = vmatpush3.bf16.msra.mxu0 %v1200_v2  ;;  %1079 = vmatpush3.bf16.msra.mxu1 %v1203_v4  ;;  %s1351_s20 = scalar_lea.vmem %s1874_s26, 64  ;;  %p2069_p4 = scmp.ne.s32.totalorder %s2047_s15, 0 }
  0xc6   : > { %1084 = vmatprep.subr.bf16.mxu0 %v1510_v0  ;;  %p1352_p2 = scmp.ne.s32.totalorder %s1874_s26, %s1351_s20  ;;  %s1512_s24 = smov [#allocation12]  }
  0xc7   : > { %s1355_s8 = sshll.u32 %s1512_s24, 4  ;;  %s1356_s8 = int_to_ptr.vmem [resolvable:$false] %s1355_s8 }
  0xc8   : > { %1073 = vmatmul.mubr.msk.bf16.vlgmr.msra.gmra.mrb[0].mxu0 %vm574_vm1, %v548_v5  ;;  %1081 = vmatmul.mubr.msk.bf16.vlgmr.msra.gmra.mrb[0].mxu1 %vm574_vm1, %v549_v7  ;;  %v1047_v25 = vld [vmem:[%s2066_s25] ss:$0 sm:$0xff]  ;;  %p1353_p1 = pnand %p1352_p2, %p2069_p4  ;;  %s1357_s25 = scalar_lea.vmem %s1356_s8, 128 }
  0xc9   : > { %1085 = vmatpush3.bf16.msra.mxu0 %v1202_v6  ;;  %1088 = vmatprep.mubr.msk.bf16.mxu0 %vm1511_vm0, %v1510_v0  ;;  %s2068_s14 = smov %s2067_s22  ;;  %s1883_s30 = scalar_lea.hbm %s2067_s22, %s1864_s29 }
  0xca   : > { %1086 = vmatprep.subr.bf16.mxu0 %v1510_v0  ;;  %p1354_p3 = pneg %p1353_p1  ;;  %p1358_p11 = scmp.lt.s32.totalorder %s1874_s26, %s1356_s8 }
  0xcb   : > { %p1359_p10 = scmp.lt.s32.totalorder %s1357_s25, %s1351_s20 }
  0xcd   : > { %1087 = vmatpush3.bf16.msra.mxu0 %v1204_v8  ;;  %p1360_p6 = por %p1359_p10, %p1358_p11 }
  0xcf   : > { %p1361_p8 = pnand %p1360_p6, %p1354_p3 }
  0xd0   : > { %1089 = vmatmul.mubr.msk.bf16.vlgmr.msra.gmra.mrb[4].mxu0 %vm574_vm1, %v550_v9 }
 0x19b   : > { %v612_v11 = vpop.f32.mrb[0].mxu0  ;;  %v678_v16 = vpop.f32.mrb[0].mxu1 }
 0x19c   : > { %v613_v13 = vadd.f32 %v1039_v10, %v612_v11  ;;  %v1074_v14 = vpop.f32.mrb[1].mxu0  ;;  %v679_v19 = vadd.f32 %v1043_v12, %v678_v16  ;;  %v1082_v20 = vpop.f32.mrb[1].mxu1 }
 0x19d   : > { %v615_v15 = vpop.f32.mrb[2].mxu0  ;;  %v681_v21 = vpop.f32.mrb[2].mxu1 }
 0x19e   : > { %v750_v17 = vmul.f32 0.35355338, %v613_v13  ;;  %v1075_v18 = vpop.f32.mrb[3].mxu0  ;;  %v754_v23 = vpack.c.bf16 %v679_v19, %v679_v19  ;;  %v1083_v24 = vpop.f32.mrb[3].mxu1 }
 0x1a0   : > { %v751_v22 = vpack.c.bf16 %v750_v17, %v750_v17  ;;  %755 = vst.msk [vmem:[%s539_s12] sm:$0xf] %vm752_vm2, %v754_v23 }
 0x1a2   : > { %753 = vst.msk [vmem:[%s532_s13] sm:$0xf] %vm752_vm2, %v751_v22 }
 0x1a3   : > { %v744_v26 = vpop.f32.mrb[4].mxu0 }
 0x1a4   : > { %1364 = shalt.err (!%p1361_p8)
}
 0x1a5   : > { %s1365_s23 = scalar_lea.hbm %s1872_s27, 64  ;;  %s1369_s13 = scalar_lea.hbm %s2005_s10, 128 }
 0x1a6   : > { %p1366_p0 = scmp.ne.s32.totalorder %s1872_s27, %s1365_s23  ;;  %p1370_p7 = scmp.lt.u32.totalorder %s1872_s27, %s2005_s10 }
 0x1a7   : > { %p1371_p13 = scmp.lt.u32.totalorder %s1369_s13, %s1365_s23  ;;  %p1373_p2 = scmp.lt.u32.totalorder %s1365_s23, %s1872_s27 }
 0x1a8   : > { %p1367_p5 = pnand %p1366_p0, %p2069_p4 }
 0x1a9   : > { %p1372_p9 = por %p1371_p13, %p1370_p7 }
 0x1aa   : > { %p1368_p12 = pneg %p1367_p5 }
 0x1ab   : > { %p1374_p1 = por %p1373_p2, %p1372_p9 }
 0x1ad   : > { %p1375_p3 = pnand %p1374_p1, %p1368_p12 }
 0x1af   : > { %1378 = shalt.err (!%p1375_p3)
}
 0x1b0   : > { %1107 = dma.vmem_to_hbm [thread:$0]  (%p2069_p4), %s1874_s26, 64, %s1872_s27, %s1896_s9   ;;  %v745_v27 = vadd.f32 %v1047_v25, %v744_v26  ;;  %v1090_v28 = vpop.f32.mrb[5].mxu0 }
 0x1b1   : > { %s759_s22 = scalar_lea.sflag [#allocation4], %s1822_s3  ;;  %s1379_s20 = scalar_lea.vmem %s1885_s4, 64 }
 0x1b2   : > { %p1380_p11 = scmp.ne.s32.totalorder %s1885_s4, %s1379_s20  ;;  %s1513_s24 = smov [#allocation11]  }
 0x1b3   : > { %s1383_s8 = sshll.u32 %s1513_s24, 4  ;;  %s1384_s8 = int_to_ptr.vmem [resolvable:$false] %s1383_s8 }
 0x1b4   : > { %p1381_p10 = pnand %p1380_p11, %p2069_p4  ;;  %s1385_s25 = scalar_lea.vmem %s1384_s8, 128 }
 0x1b5   : > { %p1386_p8 = scmp.lt.s32.totalorder %s1885_s4, %s1384_s8  ;;  %p1387_p0 = scmp.lt.s32.totalorder %s1385_s25, %s1379_s20 }
 0x1b6   : > { %p1382_p6 = pneg %p1381_p10 }
 0x1b7   : > { %p1388_p5 = por %p1387_p0, %p1386_p8 }
 0x1b9   : > { %p1389_p12 = pnand %p1388_p5, %p1382_p6 }
 0x1bb   : > { %1392 = shalt.err (!%p1389_p12)
}
 0x1bc   : > { %s1393_s3 = scalar_lea.hbm %s1883_s30, 64  ;;  %s1397_s23 = scalar_lea.hbm %s2068_s14, 128 }
 0x1bd   : > { %p1394_p7 = scmp.ne.s32.totalorder %s1883_s30, %s1393_s3  ;;  %p1398_p2 = scmp.lt.u32.totalorder %s1883_s30, %s2068_s14 }
 0x1be   : > { %p1399_p1 = scmp.lt.u32.totalorder %s1397_s23, %s1393_s3  ;;  %p1401_p11 = scmp.lt.u32.totalorder %s1393_s3, %s1883_s30 }
 0x1bf   : > { %p1395_p13 = pnand %p1394_p7, %p2069_p4 }
 0x1c0   : > { %p1400_p3 = por %p1399_p1, %p1398_p2 }
 0x1c1   : > { %p1396_p9 = pneg %p1395_p13 }
 0x1c2   : > { %p1402_p10 = por %p1401_p11, %p1400_p3 }
 0x1c4   : > { %p1403_p6 = pnand %p1402_p10, %p1396_p9 }
 0x1c6   : > { %1406 = shalt.err (!%p1403_p6)
}
 0x1c7   : > { %1106 = dma.vmem_to_hbm [thread:$0]  (%p2069_p4), %s1885_s4, 64, %s1883_s30, %s759_s22   ;;  %v747_v29 = vpop.f32.mrb[6].mxu0  ;;  %v756_v30 = vpack.c.bf16 %v745_v27, %v745_v27 }
 0x1c8   : > { %v1091_v31 = vpop.f32.mrb[7].mxu0  ;;  %s2070_s16 = sld [smem:[#allocation31_spill]]  ;;  %s1407_s24 = scalar_lea.vmem %s812_s28, 64 }
 0x1c9   : > { %757 = vst.msk [vmem:[%s546_s17] sm:$0xf] %vm752_vm2, %v756_v30  ;;  %p1408_p8 = scmp.ne.s32.totalorder %s812_s28, %s1407_s24  ;;  %s1514_s8 = smov [#allocation14]  }
 0x1ca   : > { %s1411_s25 = sshll.u32 %s1514_s8, 4  ;;  %s1412_s25 = int_to_ptr.vmem [resolvable:$false] %s1411_s25 }
 0x1cb   : > { %p1409_p0 = pnand %p1408_p8, %p2069_p4  ;;  %s1413_s4 = scalar_lea.vmem %s1412_s25, 128 }
 0x1cc   : > { %p1414_p12 = scmp.lt.s32.totalorder %s812_s28, %s1412_s25  ;;  %p1415_p7 = scmp.lt.s32.totalorder %s1413_s4, %s1407_s24 }
 0x1cd   : > { %p1410_p5 = pneg %p1409_p0 }
 0x1ce   : > { %s1946_s20 = scalar_lea.hbm %s2070_s16, %s1864_s29  ;;  %p1416_p13 = por %p1415_p7, %p1414_p12 }
 0x1d0   : > { %p1417_p9 = pnand %p1416_p13, %p1410_p5 }
 0x1d2   : > { %1420 = shalt.err (!%p1417_p9)
}
 0x1d3   : > { %s1421_s21 = scalar_lea.hbm %s1946_s20, 64  ;;  %s1425_s17 = scalar_lea.hbm %s2070_s16, 128 }
 0x1d4   : > { %p1422_p2 = scmp.ne.s32.totalorder %s1946_s20, %s1421_s21  ;;  %p1426_p11 = scmp.lt.u32.totalorder %s1946_s20, %s2070_s16 }
 0x1d5   : > { %p1427_p10 = scmp.lt.u32.totalorder %s1425_s17, %s1421_s21  ;;  %p1429_p8 = scmp.lt.u32.totalorder %s1421_s21, %s1946_s20 }
 0x1d6   : > { %p1423_p1 = pnand %p1422_p2, %p2069_p4 }
 0x1d7   : > { %p1428_p6 = por %p1427_p10, %p1426_p11 }
 0x1d8   : > { %p1424_p3 = pneg %p1423_p1 }
 0x1d9   : > { %p1430_p0 = por %p1429_p8, %p1428_p6 }
 0x1db   : > { %p1431_p5 = pnand %p1430_p0, %p1424_p3 }
 0x1dd   : > { %1434 = shalt.err (!%p1431_p5)
}
 0x1de   : > { %1108 = dma.vmem_to_hbm [thread:$0]  (%p2069_p4), %s812_s28, 64, %s1946_s20, %s1896_s9  }
 0x1df PF: > { %s2071_s26 = sld [smem:[#allocation20_spill]]  ;;  %s2072_s27 = sld [smem:[#allocation23_spill]] }
 0x1e0   : > { %s2073_s23 = sld [smem:[#allocation22_spill]] }
 0x1e5   : > { %s823_s11 = sand.u32 1, %s2071_s26   ;;  %p2074_p12 = scmp.ne.s32.totalorder %s2072_s27, 0 }
 0x1e6   : > { %p2075_p7 = scmp.ge.s32.totalorder %s2073_s23, 2  ;;  %s824_s12 = scalar_lea.sflag [#allocation4], %s823_s11 }
 0x1e8   : > { %p1130_p13 = pnand %p2075_p7, %p2074_p12 }
 0x1ea   : > { %1472 = dma.done.wait (!%p1130_p13), %s824_s12, 64  }
 0x1eb   : > { %1474 = vsyncadd (!%p1130_p13), %s824_s12, 4294967232  ;;  %s2076_s13 = sadd.s32 4294967294, %s2073_s23  }
 0x1ec   : > { %s832_s1 = sand.u32 1, %s2076_s13  }
 0x1ed   : > { %s833_s24 = scalar_lea.sflag [#allocation13], %s832_s1 }
 0x1ee   : > { %1476 = dma.done.wait (!%p1130_p13), %s833_s24, 128  }
 0x1ef   : > { %1478 = vsyncadd (!%p1130_p13), %s833_s24, 4294967168  ;;  %s35_s22 = sadd.s32 1, %s2073_s23   ;;  %s2077_s15 = sld [smem:[#allocation25_spill]] }
 0x1f0   : > { %p32_p4 = scmp.ge.s32.totalorder %s35_s22, 4   ;;  %s2078_s20 = sld [smem:[#allocation21_spill]] }
 0x1f1   : > { %s2079_s21 = sld [smem:[#allocation24_spill]]  ;;  %s2080_s17 = smov %s1485_s18 }
 0x1f2   : > { %s2081_s18 = smov %s1489_s19  ;;  %34 = sbr.rel (!%p32_p4) target bundleno = 18 (0x12), region = 165 }
 0x1f5   : > { %s2082_s19 = smov %s2077_s15 }
 0x1f9   :  { %847 = vsyncpa [#allocation3], 1 }
 0x1fa   :  { %849 = vsyncpa [#allocation3 + $0x1], 1 }
 0x1fb   :  { %850 = vsyncpa [#allocation6], 1 }
 0x1fc   :  { %852 = vsyncpa [#allocation6 + $0x1], 1 }
 0x1fd   :  { %853 = vsyncpa [#allocation9], 1 }
 0x1fe   :  { %854 = vsyncpa [#allocation4], 1 }
 0x1ff   :  { %856 = vsyncpa [#allocation4 + $0x1], 1 }
 0x200   :  { %857 = vsyncpa [#allocation13], 1 }
 0x201   :  { %859 = vsyncpa [#allocation13 + $0x1], 1 }

</bundles_post_ra>
